<compile_context>
chip_gen: v6e
topology: v6e:2x2x1
jax: 0.10.0
libtpu: 0.0.40
codegen_flags: <defaults>
</compile_context>

<pallas_src>
from dataclasses import dataclass
from typing import Callable, Optional

import jax
import jax.numpy as jnp
from jax.experimental import pallas as pl
from jax.experimental.pallas import tpu as pltpu


# ----------------------------------------------------------------------------
# Pallas kernel: identity copy (only used when hooks need a materialized copy)
# ----------------------------------------------------------------------------
def _identity_kernel(x_ref, o_ref):
    # Pure identity: copy the current VMEM tile to the output tile.
    o_ref[...] = x_ref[...]


_DEFAULT_TILE_BYTES = 2 * 1024 * 1024  # conservative fallback


def _select_budget():
    """Pick (tile_bytes, vmem_limit_bytes) for the current TPU generation.

    4 MiB tiles with a 3-deep input pipeline + 2-deep output pipeline keep the
    worst-case live footprint at ~20 MiB, which we cover with an explicit
    scoped-VMEM limit of min(32 MiB, physical/2) -- safe on v5e/v6e (128 MiB
    physical) and v7x (64 MiB physical).  If the hardware query is unavailable
    we fall back to 2 MiB tiles and the default scoped-VMEM limit.
    """
    try:
        vmem_phys = int(pltpu.get_tpu_info().vmem_capacity_bytes)
    except Exception:
        return _DEFAULT_TILE_BYTES, None
    tile = 4 * 1024 * 1024
    vmem_limit = min(32 * 1024 * 1024, vmem_phys // 2)
    if 5 * tile > vmem_limit:
        tile = _DEFAULT_TILE_BYTES
    return tile, vmem_limit


def hook_point_identity(x: jax.Array) -> jax.Array:
    """Identity as a tiled, lane-dense Pallas HBM->HBM copy."""
    orig_shape = x.shape
    if x.ndim == 0:
        x2 = x.reshape(1, 1)
    elif x.ndim == 1:
        x2 = x.reshape(1, -1)
    else:
        x2 = x.reshape(-1, orig_shape[-1])

    rows, cols = x2.shape
    itemsize = jnp.dtype(x2.dtype).itemsize
    tile_budget, vmem_limit = _select_budget()

    # Row granularity = one full packed-sublane group for the dtype
    # (8 rows for f32, 16 for bf16, 32 for int8/fp8) -> unmasked packed stores.
    granule = 8 * max(1, 4 // itemsize)

    # ---- Lane (last) axis ----------------------------------------------------
    # Prefer the full hidden dim (always legal, lane-dense, zero padding).  Only
    # split it when even a single granule-row slab of the full hidden would blow
    # the tile budget; then use large 128-multiple column tiles (the last block
    # may be partial/masked if cols is not a multiple of the tile).
    tile_cols = cols
    if granule * cols * itemsize > tile_budget:
        tile_cols = max(128, (tile_budget // (granule * itemsize)) // 128 * 128)
        if cols % 128 == 0:
            # Prefer an exact divisor so every column block stays unmasked.
            while cols % tile_cols != 0 and tile_cols > 128:
                tile_cols -= 128

    # ---- Sublane (row) axis ----------------------------------------------------
    row_bytes = max(1, tile_cols * itemsize)
    budget_rows = max(granule, (tile_budget // row_bytes) // granule * granule)
    tile_rows = rows if rows <= budget_rows else budget_rows

    grid_rows = pl.cdiv(rows, tile_rows)
    grid_cols = pl.cdiv(cols, tile_cols)

    # A pure-DMA kernel has no compute to hide DMA issue latency under; for
    # many-block copies keep the inbound queue full with a 3rd input buffer.
    if grid_rows * grid_cols >= 4:
        in_spec = pl.BlockSpec((tile_rows, tile_cols), lambda i, j: (i, j),
                               pipeline_mode=pl.Buffered(3))
    else:
        in_spec = pl.BlockSpec((tile_rows, tile_cols), lambda i, j: (i, j))
    out_spec = pl.BlockSpec((tile_rows, tile_cols), lambda i, j: (i, j))

    params = {"dimension_semantics": ("parallel", "parallel")}
    if vmem_limit is not None:
        params["vmem_limit_bytes"] = int(vmem_limit)

    out = pl.pallas_call(
        _identity_kernel,
        out_shape=jax.ShapeDtypeStruct((rows, cols), x2.dtype),
        grid=(grid_rows, grid_cols),
        in_specs=[in_spec],
        out_specs=out_spec,
        cost_estimate=pl.CostEstimate(
            flops=0,
            transcendentals=0,
            bytes_accessed=2 * rows * cols * itemsize,
        ),
        compiler_params=pltpu.CompilerParams(**params),
    )(x2)

    return out.reshape(orig_shape)


# ----------------------------------------------------------------------------
# Host-side HookPoint bookkeeping (mirrors transformer_lens.HookPoint)
# ----------------------------------------------------------------------------
@dataclass
class LensHandle:
    """Host-side record of a registered hook."""
    hook: Callable
    is_permanent: bool = False
    context_level: Optional[int] = None


class HookPoint:
    """JAX/Pallas port of transformer_lens.HookPoint.

    forward(x) is the identity.  With no hooks attached it returns x directly
    (zero device work).  With fwd hooks attached, the Pallas identity-copy
    kernel materializes a distinct activation buffer that hooks observe and may
    replace.
    """

    def __init__(self):
        self.fwd_hooks: list = []
        self.bwd_hooks: list = []
        self.ctx: dict = {}
        self.name: Optional[str] = None

    def add_hook(self, hook, dir="fwd", is_permanent=False, level=None,
                 prepend=False) -> None:
        handle = LensHandle(hook, is_permanent, level)
        if dir == "fwd":
            target = self.fwd_hooks
        elif dir == "bwd":
            # TODO(synk): backward hooks require autograd interception
            # (custom_vjp); no Pallas forward-kernel equivalent. Stored only.
            target = self.bwd_hooks
        else:
            raise ValueError(f"Invalid direction {dir}")
        if prepend:
            target.insert(0, handle)
        else:
            target.append(handle)

    def add_perma_hook(self, hook, dir="fwd") -> None:
        self.add_hook(hook, dir=dir, is_permanent=True)

    def remove_hooks(self, dir="fwd", including_permanent=False,
                     level=None) -> None:
        def _filter(handles):
            kept = []
            for h in handles:
                if including_permanent:
                    continue
                if not h.is_permanent and (level is None or h.context_level == level):
                    continue
                kept.append(h)
            return kept

        if dir not in ("fwd", "bwd", "both"):
            raise ValueError(f"Invalid direction {dir}")
        if dir in ("fwd", "both"):
            self.fwd_hooks = _filter(self.fwd_hooks)
        if dir in ("bwd", "both"):
            self.bwd_hooks = _filter(self.bwd_hooks)

    def clear_context(self):
        self.ctx = {}

    def layer(self):
        if self.name is None:
            raise ValueError("Name cannot be None")
        return int(self.name.split(".")[1])

    def __call__(self, x):
        return self.forward(x)

    def forward(self, x: jax.Array) -> jax.Array:
        # Hot path: identity needs 0 bytes of HBM traffic -> never launch the
        # kernel when no forward hook is attached.
        if not self.fwd_hooks:
            return x
        # Hooked path: one tiled HBM read+write so hook functions observe a
        # distinct, materialized activation buffer (and may replace it).
        out = hook_point_identity(x)
        for handle in self.fwd_hooks:
            result = handle.hook(out, hook=self)
            if result is not None:
                out = result
        return out


if __name__ == "__main__":
    # Small activation consistent with a transformer intermediate:
    # (batch=2, seq=8, hidden=32)
    key = jax.random.PRNGKey(0)
    x = jax.random.normal(key, (2, 8, 32), dtype=jnp.float32)

    hp = HookPoint()
    hp.name = "blocks.0.hook_resid_pre"

    # 1) Hot path: no hooks attached -> pure identity, no kernel launch.
    y_fast = jax.block_until_ready(hp(x))
    assert y_fast.shape == x.shape and y_fast.dtype == x.dtype
    assert bool(jnp.array_equal(y_fast, x))

    # 2) Hooked path: the Pallas identity-copy kernel runs once; the hook sees
    #    the materialized activation.
    def capture_hook(tensor, *, hook):
        hook.ctx["activation"] = tensor
        return None

    hp.add_hook(capture_hook, dir="fwd")
    y = jax.block_until_ready(hp(x))

    # HookPoint is an identity: output must equal input exactly.
    assert y.shape == x.shape and y.dtype == x.dtype
    assert bool(jnp.array_equal(y, x))
    assert "activation" in hp.ctx
    assert bool(jnp.array_equal(hp.ctx["activation"], x))
    assert hp.layer() == 0

    hp.remove_hooks()
    assert not hp.fwd_hooks

    print("KERNEL_OK")
</pallas_src>

<mosaic_0001>
module attributes {stable_mosaic.version = 11 : i64} {
  func.func @_identity_kernel(%arg0: i32, %arg1: i32, %arg2: memref<16x32xf32, #tpu.memory_space<vmem>>, %arg3: memref<16x32xf32, #tpu.memory_space<vmem>>) attributes {dimension_semantics = [#tpu.dimension_semantics<parallel>, #tpu.dimension_semantics<parallel>], iteration_bounds = array<i64: 1, 1>, scalar_prefetch = 0 : i64, scratch_operands = 0 : i64, tpu.core_type = #tpu.core_type<tc>, window_params = [{transform_indices = @transform_0, window_bounds = array<i64: 16, 32>}, {transform_indices = @transform_1, window_bounds = array<i64: 16, 32>}]} {
    %c0 = arith.constant 0 : index
    %c0_0 = arith.constant 0 : index
    %0 = vector.load %arg2[%c0, %c0_0] : memref<16x32xf32, #tpu.memory_space<vmem>>, vector<16x32xf32>
    %c0_1 = arith.constant 0 : index
    %c0_2 = arith.constant 0 : index
    %1 = vector.load %arg3[%c0_1, %c0_2] : memref<16x32xf32, #tpu.memory_space<vmem>>, vector<16x32xf32>
    tpu.vector_store %arg3[%c0_1, %c0_2], %0 {strides = array<i32>} : memref<16x32xf32, #tpu.memory_space<vmem>>, vector<16x32xf32>,
    return
  }
  func.func @transform_0(%arg0: i32, %arg1: i32) -> (i32, i32) {
    %c0_i32 = arith.constant 0 : i32
    return %arg0, %arg1 : i32, i32
  }
  func.func @transform_1(%arg0: i32, %arg1: i32) -> (i32, i32) {
    %c0_i32 = arith.constant 0 : i32
    return %arg0, %arg1 : i32, i32
  }
}

</mosaic_0001>

<bundles_post_ra>
// kernel: tpu_custom_call.1
= control target key start
LH: loop header
LB: loop body
LE: loop exit
PB: predicated region body
PF: predicated region fallthrough
CT: control target
= control target key end

     0   :  { %6 = vsyncpa [#allocation3], 0  ;;  %s113_s0 = inlined_call_operand.hbm [shape: f32[16,32], index: 0, kind: input, shape index: {}]   ;;  %s114_s1 = inlined_call_operand.hbm [shape: f32[16,32], index: 1, kind: output, shape index: {}]  }
   0x1   :  { %7 = vsyncpa [#allocation4], 0  ;;  %s93_s6 = smov [#allocation2]  }
   0x2   :  { %s13_s7 = sshll.u32 %s93_s6, 4  ;;  %s14_s7 = int_to_ptr.vmem [resolvable:$true] %s13_s7 }
   0x3   :  { %s57_s8 = scalar_lea.vmem %s14_s7, 256  ;;  %p62_p1 = scmp.lt.s32.totalorder %s14_s7, %s14_s7 }
   0x4   :  { %p58_p0 = scmp.ne.s32.totalorder %s14_s7, %s57_s8  ;;  %p63_p2 = scmp.lt.s32.totalorder %s57_s8, %s57_s8 }
   0x6   :  { %p64_p3 = por %p63_p2, %p62_p1 }
   0x8   :  { %p65_p4 = pnand %p64_p3, %p58_p0 }
   0xa   :  { %68 = shalt.err (!%p65_p4)
}
   0xb   :  { %s94_s9 = smov 128   ;;  %s95_s10 = smov 8  }
   0xc   :  { %19 = dma.hbm_to_vmem [thread:$0]  %s113_s0, 256, %s14_s7, [#allocation3], %s94_s9, %s94_s9, %s95_s10  }
   0xd   :  { %89 = dma.done.wait [#allocation3], 256  }
   0xe   :  { %90 = vsyncadd [#allocation3], 4294967040  ;;  %s96_s13 = smov [#allocation5]   ;;  %vm25_vm0 = vcmask 261120   ;;  %v23_v0 = vld [vmem:[#allocation2] sm:$0xff]  ;;  %v24_v1 = vld [vmem:[#allocation2 + $0x8] sm:$0xff] }
   0xf   :  { %s33_s14 = sshll.u32 %s96_s13, 4  ;;  %26 = vst.msk [vmem:[#allocation5] sm:$0xff] %vm25_vm0, %v23_v0  ;;  %27 = vst.msk [vmem:[#allocation5 + $0x8] sm:$0xff] %vm25_vm0, %v24_v1  ;;  %s34_s14 = int_to_ptr.vmem [resolvable:$true] %s33_s14 }
  0x10   :  { %s69_s15 = scalar_lea.vmem %s34_s14, 256  ;;  %p74_p6 = scmp.lt.s32.totalorder %s34_s14, %s34_s14 }
  0x11   :  { %p70_p5 = scmp.ne.s32.totalorder %s34_s14, %s69_s15  ;;  %p75_p7 = scmp.lt.s32.totalorder %s69_s15, %s69_s15 }
  0x13   :  { %p76_p8 = por %p75_p7, %p74_p6 }
  0x15   :  { %p77_p9 = pnand %p76_p8, %p70_p5 }
  0x17   :  { %80 = shalt.err (!%p77_p9)
}
  0x18   :  { %39 = dma.vmem_to_hbm [thread:$0]  %s34_s14, 256, %s114_s1, [#allocation4], %s94_s9, %s94_s9, %s95_s10  }
  0x19   :  { %91 = dma.done.wait [#allocation4], 256  }
  0x1a   :  { %92 = vsyncadd [#allocation4], 4294967040 }
  0x1b   :  { %43 = vsyncpa [#allocation3], 1 }
  0x1c   :  { %44 = vsyncpa [#allocation4], 1 }

</bundles_post_ra>
